<compile_context>
chip_gen: v7x
topology: tpu7x:2x2x1
jax: 0.10.0
libtpu: 0.0.40
codegen_flags: <defaults>
</compile_context>

<pallas_src>
import functools

import jax
import jax.numpy as jnp
import numpy as np
from jax import lax
from jax.experimental import pallas as pl
from jax.experimental.pallas import tpu as pltpu


# ----------------------------------------------------------------------------
# Pallas kernel: full ResidualVectorQuantize forward, grid = (token_tiles, N)
# ----------------------------------------------------------------------------
def _rvq_kernel(x_ref, w_in_ref, b_in_ref, cnt_ref, cb_ref, wq_ref, bo_ref,
                zq_ref, codes_ref, lat_ref, loss_ref,
                res_sc,
                *, tile_bt, bt_valid, masked):
    n = pl.program_id(1)          # quantizer index (sequential residual carry)

    @pl.when(n == 0)
    def _():
        res_sc[...] = x_ref[...]
        zq_ref[...] = jnp.zeros_like(zq_ref)
        loss_ref[...] = jnp.zeros_like(loss_ref)

    r = res_sc[...]                                               # [T, D]

    # in_proj: weight-normalized 1x1 conv == channel matmul
    z_e = jnp.dot(r, w_in_ref[0],
                  preferred_element_type=jnp.float32) + b_in_ref[0]   # [T, d]
    lat_ref[0] = z_e

    # nearest-code search: argmin of the l2-normalized distance equals
    # argmax of z_e @ c_n^T (positive per-row scaling and the constant
    # ||c_n||^2 terms do not change the argmin).  c_n^T is precomputed.
    scores = jnp.dot(z_e, cnt_ref[0],
                     preferred_element_type=jnp.float32)          # [T, K]
    idx = jnp.argmax(scores, axis=-1).astype(jnp.int32)           # [T]
    codes_ref[0] = idx[:, None]

    K = scores.shape[-1]
    onehot = (idx[:, None] ==
              lax.broadcasted_iota(jnp.int32, (tile_bt, K), 1)
              ).astype(jnp.float32)                               # [T, K]

    # commitment / codebook loss: accumulate sum((z_e - z_q)^2) per token tile;
    # the mean (divide by BT*d) is taken once in the wrapper.  onehot @ cb is
    # an exact gather (single nonzero per row).
    z_q = jnp.dot(onehot, cb_ref[0],
                  preferred_element_type=jnp.float32)             # [T, d]
    diff = z_e - z_q
    sq = diff * diff
    if masked:   # static: only emitted when BT was padded up to a tile multiple
        row = (pl.program_id(0) * tile_bt
               + lax.broadcasted_iota(jnp.int32, (tile_bt, 1), 0))
        sq = jnp.where(row < bt_valid, sq, 0.0)
    loss_ref[...] = loss_ref[...] + jnp.sum(sq)

    # straight-through forward value is z_q; fused gather + out_proj:
    #   z_q @ w_out == onehot @ (cb @ w_out)   (fused weight precomputed)
    z_q_up = jnp.dot(onehot, wq_ref[0],
                     preferred_element_type=jnp.float32) + bo_ref[0]  # [T, D]

    zq_ref[...] = zq_ref[...] + z_q_up
    res_sc[...] = r - z_q_up


def run_rvq(x_tokens, params, *, max_tile=512):
    """One (possibly fused) ResidualVectorQuantize forward on [BT, D] tokens.

    Returns (z_q [BT,D], codes [N,BT] int32, latents [N,BT,d],
             loss = sum_n mean((z_e_n - z_q_n)^2)).
    """
    w_in, b_in, c_nT, cb, w_qout, b_out = params[:6]
    N, D, d = w_in.shape
    K = cb.shape[1]
    BT = x_tokens.shape[0]

    # token tile: multiple of 8; either the full (8-padded) BT or max_tile
    bt8 = -(-BT // 8) * 8
    tile = bt8 if bt8 <= max_tile else max_tile
    bt_pad = -(-BT // tile) * tile
    num_tiles = bt_pad // tile
    if bt_pad != BT:
        x_tokens = jnp.pad(x_tokens, ((0, bt_pad - BT), (0, 0)))

    kernel = functools.partial(_rvq_kernel, tile_bt=tile, bt_valid=BT,
                               masked=(bt_pad != BT))

    grid_spec = pltpu.PrefetchScalarGridSpec(
        num_scalar_prefetch=0,
        grid=(num_tiles, N),
        in_specs=[
            pl.BlockSpec((tile, D), lambda t, n: (t, 0)),    # x (resident over N)
            pl.BlockSpec((1, D, d), lambda t, n: (n, 0, 0)),  # w_in
            pl.BlockSpec((1, 1, d), lambda t, n: (n, 0, 0)),  # b_in
            pl.BlockSpec((1, d, K), lambda t, n: (n, 0, 0)),  # c_n^T (normalized)
            pl.BlockSpec((1, K, d), lambda t, n: (n, 0, 0)),  # codebook
            pl.BlockSpec((1, K, D), lambda t, n: (n, 0, 0)),  # cb @ w_out (fused)
            pl.BlockSpec((1, 1, D), lambda t, n: (n, 0, 0)),  # b_out
        ],
        out_specs=[
            pl.BlockSpec((tile, D), lambda t, n: (t, 0)),        # z_q (accumulated)
            pl.BlockSpec((1, tile, 1), lambda t, n: (n, t, 0)),  # codes
            pl.BlockSpec((1, tile, d), lambda t, n: (n, t, 0)),  # latents (z_e)
            pl.BlockSpec((1, 1, 1), lambda t, n: (t, 0, 0)),     # per-tile loss sum
        ],
        scratch_shapes=[
            pltpu.VMEM((tile, D), jnp.float32),                  # residual carry
        ],
    )
    out_shape = (
        jax.ShapeDtypeStruct((bt_pad, D), jnp.float32),
        jax.ShapeDtypeStruct((N, bt_pad, 1), jnp.int32),
        jax.ShapeDtypeStruct((N, bt_pad, d), jnp.float32),
        jax.ShapeDtypeStruct((num_tiles, 1, 1), jnp.float32),
    )
    z_q, codes, lats, loss_tiles = pl.pallas_call(
        kernel,
        grid_spec=grid_spec,
        out_shape=out_shape,
        compiler_params=pltpu.CompilerParams(
            dimension_semantics=("parallel", "arbitrary"),
            vmem_limit_bytes=32 * 1024 * 1024),
    )(x_tokens, w_in, b_in, c_nT, cb, w_qout, b_out)

    loss = jnp.sum(loss_tiles) / jnp.float32(BT * d)
    return z_q[:BT], codes[:, :BT, 0], lats[:, :BT], loss


# ----------------------------------------------------------------------------
# Deterministic parameter construction (weight-normalized 1x1 convs, codebooks)
# ----------------------------------------------------------------------------
def _wn_conv1d_params(key, out_ch, in_ch):
    kv, kg, kb = jax.random.split(key, 3)
    v = 0.2 * jax.random.normal(kv, (out_ch, in_ch), jnp.float32)
    g = 1.0 + 0.1 * jax.random.normal(kg, (out_ch, 1), jnp.float32)
    b = 0.01 * jax.random.normal(kb, (out_ch,), jnp.float32)
    # weight_norm (dim=0): w = g * v / ||v||   (norm over non-output dims)
    w = g * v / jnp.sqrt(jnp.sum(v * v, axis=1, keepdims=True))
    return w, b                                   # w: [out, in]


def make_rvq_params(key, n_codebooks, input_dim, codebook_size, codebook_dim):
    """Returns stacked, kernel-ready parameters (+ raw w_out for the reference):
       (w_in[N,D,d], b_in[N,1,d], c_nT[N,d,K], cb[N,K,d],
        w_qout[N,K,D], b_out[N,1,D], w_out[N,d,D])."""
    eps = 1e-12
    w_in_l, b_in_l, cnt_l, cb_l, wq_l, b_out_l, w_out_l = ([] for _ in range(7))
    for _ in range(n_codebooks):
        k1, k2, k3, key = jax.random.split(key, 4)
        w_in, b_in = _wn_conv1d_params(k1, codebook_dim, input_dim)    # [d, D]
        w_out, b_out = _wn_conv1d_params(k2, input_dim, codebook_dim)  # [D, d]
        cb = jax.random.normal(k3, (codebook_size, codebook_dim), jnp.float32)
        c_n = cb / jnp.maximum(
            jnp.linalg.norm(cb, axis=-1, keepdims=True), eps)          # [K, d]
        w_out_tm = w_out.T                                             # [d, D]
        w_qout = jnp.dot(cb, w_out_tm,
                         precision=lax.Precision.HIGHEST)              # [K, D]
        w_in_l.append(w_in.T)             # [D, d]  (token-major matmul form)
        b_in_l.append(b_in[None, :])      # [1, d]
        cnt_l.append(c_n.T)               # [d, K]
        cb_l.append(cb)                   # [K, d]
        wq_l.append(w_qout)               # [K, D]
        b_out_l.append(b_out[None, :])    # [1, D]
        w_out_l.append(w_out_tm)          # [d, D]
    return (jnp.stack(w_in_l), jnp.stack(b_in_l), jnp.stack(cnt_l),
            jnp.stack(cb_l), jnp.stack(wq_l), jnp.stack(b_out_l),
            jnp.stack(w_out_l))


def _slice_params(params, m):
    return tuple(p[:m] for p in params)


# ----------------------------------------------------------------------------
# MultiSourceRVQ wrapper (eval-mode forward semantics)
# ----------------------------------------------------------------------------
class MultiSourceRVQPallas:
    def __init__(self, key, tracks=('speech', 'music', 'sfx'), input_dim=32,
                 n_codebooks=(6, 6, 6), codebook_size=(128, 128, 128),
                 codebook_dim=(8, 8, 8), shared_codebooks=4):
        self.tracks = list(tracks)
        self.input_dim = input_dim
        self.n_codebooks = list(n_codebooks)
        self.codebook_dim = list(codebook_dim)
        self.shared_codebooks = shared_codebooks
        self.track_params = {}
        for i, t in enumerate(self.tracks):
            key, sub = jax.random.split(key)
            self.track_params[t] = make_rvq_params(
                sub, n_codebooks[i] - shared_codebooks, input_dim,
                codebook_size[i], codebook_dim[i])
        key, sub = jax.random.split(key)
        self.shared_params = make_rvq_params(
            sub, shared_codebooks, input_dim, codebook_size[0], codebook_dim[0])

    def __call__(self, track_name, feats, n_quantizers=None):
        # feats: [B, D, T]  (PyTorch NCW layout)
        assert track_name in self.tracks
        ti = self.tracks.index(track_name)
        if n_quantizers is None:
            n_quantizers = self.n_codebooks[ti]
        B, D, T = feats.shape
        x = jnp.transpose(feats, (0, 2, 1)).reshape(B * T, D)

        n_track = self.n_codebooks[ti] - self.shared_codebooks
        chunks = []
        m_track = min(n_quantizers, n_track)
        if m_track > 0:
            chunks.append(_slice_params(self.track_params[track_name], m_track))
        if self.shared_codebooks > 0 and n_quantizers > n_track:
            m_shared = min(n_quantizers - n_track, self.shared_codebooks)
            chunks.append(_slice_params(self.shared_params, m_shared))

        # Fuse track + shared stacks into ONE pallas_call when the codebook
        # shapes match (the in-kernel residual carry makes this exact); removes
        # the second launch and the extra HBM round trip for (x - z).
        if len(chunks) == 2 and all(
                a.shape[1:] == b.shape[1:] for a, b in zip(chunks[0], chunks[1])):
            chunks = [tuple(jnp.concatenate(p, axis=0) for p in zip(*chunks))]

        z = None
        codes_parts, lat_parts = [], []
        loss = jnp.zeros((), jnp.float32)
        for ch in chunks:
            res = x if z is None else x - z
            z_i, codes_i, lats_i, loss_i = run_rvq(res, ch)
            z = z_i if z is None else z + z_i
            loss = loss + loss_i
            Ni, _, di = lats_i.shape
            codes_parts.append(
                jnp.transpose(codes_i.reshape(Ni, B, T), (1, 0, 2)))   # [B,Ni,T]
            lat_parts.append(
                jnp.transpose(lats_i.reshape(Ni, B, T, di),
                              (1, 0, 3, 2)).reshape(B, Ni * di, T))    # [B,Ni*di,T]

        z_out = jnp.transpose(z.reshape(B, T, D), (0, 2, 1))           # [B,D,T]
        codes_out = jnp.concatenate(codes_parts, axis=1)               # [B,N,T]
        lats_out = jnp.concatenate(lat_parts, axis=1)                  # [B,N*d,T]
        # Jitter(p=0.0) is the identity in eval mode.
        return z_out, codes_out, lats_out, loss, loss


# ----------------------------------------------------------------------------
# Pure-JAX reference (mirrors the PyTorch math) for a correctness check
# ----------------------------------------------------------------------------
def _vq_ref(x, w_in, b_in, cb, w_out, b_out):
    hp = lax.Precision.HIGHEST
    z_e = jnp.dot(x, w_in, precision=hp) + b_in
    eps = 1e-12
    e_n = z_e / jnp.maximum(jnp.linalg.norm(z_e, axis=-1, keepdims=True), eps)
    c_n = cb / jnp.maximum(jnp.linalg.norm(cb, axis=-1, keepdims=True), eps)
    dist = (jnp.sum(e_n ** 2, -1, keepdims=True)
            - jnp.dot(2.0 * e_n, c_n.T, precision=hp)
            + jnp.sum(c_n ** 2, -1)[None, :])
    idx = jnp.argmax(-dist, axis=-1)
    z_q = cb[idx]
    loss = jnp.mean((z_e - z_q) ** 2)
    z_up = jnp.dot(z_q, w_out, precision=hp) + b_out
    return z_up, idx, loss


def _rvq_ref(x, params):
    w_in, b_in, _c_nT, cb, _w_qout, b_out, w_out = params
    res, z, loss = x, jnp.zeros_like(x), 0.0
    codes = []
    for i in range(w_in.shape[0]):
        z_up, idx, l = _vq_ref(res, w_in[i], b_in[i], cb[i], w_out[i], b_out[i])
        z = z + z_up
        res = res - z_up
        loss = loss + l
        codes.append(idx)
    return z, jnp.stack(codes), loss


if __name__ == "__main__":
    B, D, T = 2, 32, 16
    key = jax.random.PRNGKey(0)
    kparam, kfeat = jax.random.split(key)

    model = MultiSourceRVQPallas(
        kparam, tracks=['speech', 'music', 'sfx'], input_dim=D,
        n_codebooks=[6, 6, 6], codebook_size=[128, 128, 128],
        codebook_dim=[8, 8, 8], shared_codebooks=4)

    feats = jax.random.normal(kfeat, (B, D, T), jnp.float32)

    z, codes, latents, commit, cbloss = jax.block_until_ready(
        model('speech', feats))

    # sanity check against the pure-JAX reference
    x_tok = jnp.transpose(feats, (0, 2, 1)).reshape(B * T, D)
    z1r, c1r, l1r = _rvq_ref(x_tok, model.track_params['speech'])
    z2r, c2r, l2r = _rvq_ref(x_tok - z1r, model.shared_params)
    z_ref = jnp.transpose((z1r + z2r).reshape(B, T, D), (0, 2, 1))
    codes_ref = jnp.transpose(
        jnp.concatenate([c1r, c2r], axis=0).reshape(-1, B, T), (1, 0, 2))

    np.testing.assert_allclose(np.asarray(z), np.asarray(z_ref),
                               rtol=2e-3, atol=2e-3)
    np.testing.assert_array_equal(np.asarray(codes), np.asarray(codes_ref))
    np.testing.assert_allclose(float(commit), float(l1r + l2r),
                               rtol=2e-3, atol=2e-3)

    assert z.shape == (B, D, T)
    assert codes.shape == (B, 6, T)
    assert latents.shape == (B, 6 * 8, T)

    print("KERNEL_OK")
</pallas_src>

<mosaic_0001>
module attributes {stable_mosaic.version = 11 : i64} {
  func.func @_rvq_kernel(%arg0: i32, %arg1: i32, %arg2: memref<32x32xf32, #tpu.memory_space<vmem>>, %arg3: memref<1x32x8xf32, #tpu.memory_space<vmem>>, %arg4: memref<1x1x8xf32, #tpu.memory_space<vmem>>, %arg5: memref<1x8x128xf32, #tpu.memory_space<vmem>>, %arg6: memref<1x128x8xf32, #tpu.memory_space<vmem>>, %arg7: memref<1x128x32xf32, #tpu.memory_space<vmem>>, %arg8: memref<1x1x32xf32, #tpu.memory_space<vmem>>, %arg9: memref<32x32xf32, #tpu.memory_space<vmem>>, %arg10: memref<1x32x1xi32, #tpu.memory_space<vmem>>, %arg11: memref<1x32x8xf32, #tpu.memory_space<vmem>>, %arg12: memref<1x1x1xf32, #tpu.memory_space<vmem>>, %arg13: memref<32x32xf32, #tpu.memory_space<vmem>>) attributes {dimension_semantics = [#tpu.dimension_semantics<parallel>, #tpu.dimension_semantics<arbitrary>], iteration_bounds = array<i64: 1, 6>, scalar_prefetch = 0 : i64, scratch_operands = 1 : i64, tpu.core_type = #tpu.core_type<tc>, window_params = [{transform_indices = @transform_0, window_bounds = array<i64: 32, 32>}, {transform_indices = @transform_1, window_bounds = array<i64: 1, 32, 8>}, {transform_indices = @transform_2, window_bounds = array<i64: 1, 1, 8>}, {transform_indices = @transform_3, window_bounds = array<i64: 1, 8, 128>}, {transform_indices = @transform_4, window_bounds = array<i64: 1, 128, 8>}, {transform_indices = @transform_5, window_bounds = array<i64: 1, 128, 32>}, {transform_indices = @transform_6, window_bounds = array<i64: 1, 1, 32>}, {transform_indices = @transform_7, window_bounds = array<i64: 32, 32>}, {transform_indices = @transform_8, window_bounds = array<i64: 1, 32, 1>}, {transform_indices = @transform_9, window_bounds = array<i64: 1, 32, 8>}, {transform_indices = @transform_10, window_bounds = array<i64: 1, 1, 1>}]} {
    %c0_i32 = arith.constant 0 : i32
    %0 = arith.cmpi eq, %arg1, %c0_i32 : i32
    %1 = arith.extui %0 : i1 to i32
    %c0_i32_0 = arith.constant 0 : i32
    %2 = arith.cmpi ne, %1, %c0_i32_0 : i32
    scf.if %2 {
      %c0_42 = arith.constant 0 : index
      %c0_43 = arith.constant 0 : index
      %53 = vector.load %arg2[%c0_42, %c0_43] : memref<32x32xf32, #tpu.memory_space<vmem>>, vector<32x32xf32>
      %c0_44 = arith.constant 0 : index
      %c0_45 = arith.constant 0 : index
      %54 = vector.load %arg13[%c0_44, %c0_45] : memref<32x32xf32, #tpu.memory_space<vmem>>, vector<32x32xf32>
      tpu.vector_store %arg13[%c0_44, %c0_45], %53 {strides = array<i32>} : memref<32x32xf32, #tpu.memory_space<vmem>>, vector<32x32xf32>,
      %cst_46 = arith.constant 0.000000e+00 : f32
      %55 = vector.broadcast %cst_46 : f32 to vector<32x32xf32>
      %c0_47 = arith.constant 0 : index
      %c0_48 = arith.constant 0 : index
      %56 = vector.load %arg9[%c0_47, %c0_48] : memref<32x32xf32, #tpu.memory_space<vmem>>, vector<32x32xf32>
      tpu.vector_store %arg9[%c0_47, %c0_48], %55 {strides = array<i32>} : memref<32x32xf32, #tpu.memory_space<vmem>>, vector<32x32xf32>,
      %cst_49 = arith.constant 0.000000e+00 : f32
      %57 = vector.broadcast %cst_49 : f32 to vector<1x1x1xf32>
      %c0_50 = arith.constant 0 : index
      %c0_51 = arith.constant 0 : index
      %c0_52 = arith.constant 0 : index
      %58 = vector.load %arg12[%c0_50, %c0_51, %c0_52] : memref<1x1x1xf32, #tpu.memory_space<vmem>>, vector<1x1x1xf32>
      tpu.vector_store %arg12[%c0_50, %c0_51, %c0_52], %57 {strides = array<i32>} : memref<1x1x1xf32, #tpu.memory_space<vmem>>, vector<1x1x1xf32>,
    } else {
    }
    %c0 = arith.constant 0 : index
    %c0_1 = arith.constant 0 : index
    %3 = vector.load %arg13[%c0, %c0_1] : memref<32x32xf32, #tpu.memory_space<vmem>>, vector<32x32xf32>
    %c0_2 = arith.constant 0 : index
    %c0_3 = arith.constant 0 : index
    %c0_4 = arith.constant 0 : index
    %4 = vector.load %arg3[%c0_2, %c0_3, %c0_4] : memref<1x32x8xf32, #tpu.memory_space<vmem>>, vector<1x32x8xf32>
    %5 = vector.shape_cast %4 : vector<1x32x8xf32> to vector<32x8xf32>
    %cst = arith.constant dense<0.000000e+00> : vector<32x8xf32>
    %6 = tpu.matmul %3, %5, %cst {dimension_numbers = #tpu.dot_dimension_numbers<[1], [0], [0], [1], [0, 0, 1, 1], [], []>} : vector<32x32xf32>, vector<32x8xf32>, vector<32x8xf32> -> vector<32x8xf32>
    %c0_5 = arith.constant 0 : index
    %c0_6 = arith.constant 0 : index
    %c0_7 = arith.constant 0 : index
    %7 = vector.load %arg4[%c0_5, %c0_6, %c0_7] : memref<1x1x8xf32, #tpu.memory_space<vmem>>, vector<1x1x8xf32>
    %8 = vector.shape_cast %7 : vector<1x1x8xf32> to vector<1x8xf32>
    %9 = vector.broadcast %8 : vector<1x8xf32> to vector<32x8xf32>
    %10 = arith.addf %6, %9 : vector<32x8xf32>
    %c0_8 = arith.constant 0 : index
    %c0_9 = arith.constant 0 : index
    %c0_10 = arith.constant 0 : index
    %11 = vector.load %arg11[%c0_8, %c0_9, %c0_10] : memref<1x32x8xf32, #tpu.memory_space<vmem>>, vector<1x32x8xf32>
    %12 = vector.shape_cast %11 : vector<1x32x8xf32> to vector<32x8xf32>
    %13 = vector.shape_cast %10 : vector<32x8xf32> to vector<1x32x8xf32>
    tpu.vector_store %arg11[%c0_8, %c0_9, %c0_10], %13 {strides = array<i32>} : memref<1x32x8xf32, #tpu.memory_space<vmem>>, vector<1x32x8xf32>,
    %c0_11 = arith.constant 0 : index
    %c0_12 = arith.constant 0 : index
    %c0_13 = arith.constant 0 : index
    %14 = vector.load %arg5[%c0_11, %c0_12, %c0_13] : memref<1x8x128xf32, #tpu.memory_space<vmem>>, vector<1x8x128xf32>
    %15 = vector.shape_cast %14 : vector<1x8x128xf32> to vector<8x128xf32>
    %cst_14 = arith.constant dense<0.000000e+00> : vector<32x128xf32>
    %16 = tpu.matmul %10, %15, %cst_14 {dimension_numbers = #tpu.dot_dimension_numbers<[1], [0], [0], [1], [0, 0, 1, 1], [], []>} : vector<32x8xf32>, vector<8x128xf32>, vector<32x128xf32> -> vector<32x128xf32>
    %17 = tpu.reduce_index %16 {axis = 1 : i32, kind = #tpu.reduction_kind<arg_max>} : vector<32x128xf32> -> vector<32xi32>
    %18 = vector.shape_cast %17 : vector<32xi32> to vector<32x1xi32>
    %c0_15 = arith.constant 0 : index
    %c0_16 = arith.constant 0 : index
    %c0_17 = arith.constant 0 : index
    %19 = vector.load %arg10[%c0_15, %c0_16, %c0_17] : memref<1x32x1xi32, #tpu.memory_space<vmem>>, vector<1x32x1xi32>
    %20 = vector.shape_cast %19 : vector<1x32x1xi32> to vector<32x1xi32>
    %21 = vector.shape_cast %18 : vector<32x1xi32> to vector<1x32x1xi32>
    tpu.vector_store %arg10[%c0_15, %c0_16, %c0_17], %21 {strides = array<i32>} : memref<1x32x1xi32, #tpu.memory_space<vmem>>, vector<1x32x1xi32>,
    %22 = vector.shape_cast %17 : vector<32xi32> to vector<32x1xi32>
    %23 = tpu.iota {dimensions = array<i32: 1>} : vector<32x128xi32>
    %24 = vector.broadcast %22 : vector<32x1xi32> to vector<32x128xi32>
    %25 = arith.cmpi eq, %24, %23 : vector<32x128xi32>
    %26 = arith.extui %25 : vector<32x128xi1> to vector<32x128xi32>
    %27 = arith.sitofp %26 : vector<32x128xi32> to vector<32x128xf32>
    %c0_18 = arith.constant 0 : index
    %c0_19 = arith.constant 0 : index
    %c0_20 = arith.constant 0 : index
    %28 = vector.load %arg6[%c0_18, %c0_19, %c0_20] : memref<1x128x8xf32, #tpu.memory_space<vmem>>, vector<1x128x8xf32>
    %29 = vector.shape_cast %28 : vector<1x128x8xf32> to vector<128x8xf32>
    %cst_21 = arith.constant dense<0.000000e+00> : vector<32x8xf32>
    %30 = tpu.matmul %27, %29, %cst_21 {dimension_numbers = #tpu.dot_dimension_numbers<[1], [0], [0], [1], [0, 0, 1, 1], [], []>} : vector<32x128xf32>, vector<128x8xf32>, vector<32x8xf32> -> vector<32x8xf32>
    %31 = arith.subf %10, %30 : vector<32x8xf32>
    %32 = arith.mulf %31, %31 : vector<32x8xf32>
    %c0_22 = arith.constant 0 : index
    %c0_23 = arith.constant 0 : index
    %c0_24 = arith.constant 0 : index
    %33 = vector.load %arg12[%c0_22, %c0_23, %c0_24] : memref<1x1x1xf32, #tpu.memory_space<vmem>>, vector<1x1x1xf32>
    %34 = vector.shape_cast %32 : vector<32x8xf32> to vector<1x32x8xf32>
    %cst_25 = arith.constant dense<0.000000e+00> : vector<1xf32>
    %35 = vector.multi_reduction <add>, %34, %cst_25 [1, 2] : vector<1x32x8xf32> to vector<1xf32>
    %36 = vector.shape_cast %35 : vector<1xf32> to vector<1x1x1xf32>
    %37 = vector.extract %36[0, 0, 0] : f32 from vector<1x1x1xf32>
    %38 = vector.broadcast %37 : f32 to vector<1x1x1xf32>
    %39 = arith.addf %33, %38 : vector<1x1x1xf32>
    %c0_26 = arith.constant 0 : index
    %c0_27 = arith.constant 0 : index
    %c0_28 = arith.constant 0 : index
    %40 = vector.load %arg12[%c0_26, %c0_27, %c0_28] : memref<1x1x1xf32, #tpu.memory_space<vmem>>, vector<1x1x1xf32>
    tpu.vector_store %arg12[%c0_26, %c0_27, %c0_28], %39 {strides = array<i32>} : memref<1x1x1xf32, #tpu.memory_space<vmem>>, vector<1x1x1xf32>,
    %c0_29 = arith.constant 0 : index
    %c0_30 = arith.constant 0 : index
    %c0_31 = arith.constant 0 : index
    %41 = vector.load %arg7[%c0_29, %c0_30, %c0_31] : memref<1x128x32xf32, #tpu.memory_space<vmem>>, vector<1x128x32xf32>
    %42 = vector.shape_cast %41 : vector<1x128x32xf32> to vector<128x32xf32>
    %cst_32 = arith.constant dense<0.000000e+00> : vector<32x32xf32>
    %43 = tpu.matmul %27, %42, %cst_32 {dimension_numbers = #tpu.dot_dimension_numbers<[1], [0], [0], [1], [0, 0, 1, 1], [], []>} : vector<32x128xf32>, vector<128x32xf32>, vector<32x32xf32> -> vector<32x32xf32>
    %c0_33 = arith.constant 0 : index
    %c0_34 = arith.constant 0 : index
    %c0_35 = arith.constant 0 : index
    %44 = vector.load %arg8[%c0_33, %c0_34, %c0_35] : memref<1x1x32xf32, #tpu.memory_space<vmem>>, vector<1x1x32xf32>
    %45 = vector.shape_cast %44 : vector<1x1x32xf32> to vector<1x32xf32>
    %46 = vector.broadcast %45 : vector<1x32xf32> to vector<32x32xf32>
    %47 = arith.addf %43, %46 : vector<32x32xf32>
    %c0_36 = arith.constant 0 : index
    %c0_37 = arith.constant 0 : index
    %48 = vector.load %arg9[%c0_36, %c0_37] : memref<32x32xf32, #tpu.memory_space<vmem>>, vector<32x32xf32>
    %49 = arith.addf %48, %47 : vector<32x32xf32>
    %c0_38 = arith.constant 0 : index
    %c0_39 = arith.constant 0 : index
    %50 = vector.load %arg9[%c0_38, %c0_39] : memref<32x32xf32, #tpu.memory_space<vmem>>, vector<32x32xf32>
    tpu.vector_store %arg9[%c0_38, %c0_39], %49 {strides = array<i32>} : memref<32x32xf32, #tpu.memory_space<vmem>>, vector<32x32xf32>,
    %51 = arith.subf %3, %47 : vector<32x32xf32>
    %c0_40 = arith.constant 0 : index
    %c0_41 = arith.constant 0 : index
    %52 = vector.load %arg13[%c0_40, %c0_41] : memref<32x32xf32, #tpu.memory_space<vmem>>, vector<32x32xf32>
    tpu.vector_store %arg13[%c0_40, %c0_41], %51 {strides = array<i32>} : memref<32x32xf32, #tpu.memory_space<vmem>>, vector<32x32xf32>,
    return
  }
  func.func @transform_0(%arg0: i32, %arg1: i32) -> (i32, i32) {
    %c0_i32 = arith.constant 0 : i32
    %c0_i32_0 = arith.constant 0 : i32
    return %arg0, %c0_i32 : i32, i32
  }
  func.func @transform_1(%arg0: i32, %arg1: i32) -> (i32, i32, i32) {
    %c0_i32 = arith.constant 0 : i32
    %c0_i32_0 = arith.constant 0 : i32
    %c0_i32_1 = arith.constant 0 : i32
    return %arg1, %c0_i32, %c0_i32_0 : i32, i32, i32
  }
  func.func @transform_2(%arg0: i32, %arg1: i32) -> (i32, i32, i32) {
    %c0_i32 = arith.constant 0 : i32
    %c0_i32_0 = arith.constant 0 : i32
    %c0_i32_1 = arith.constant 0 : i32
    return %arg1, %c0_i32, %c0_i32_0 : i32, i32, i32
  }
  func.func @transform_3(%arg0: i32, %arg1: i32) -> (i32, i32, i32) {
    %c0_i32 = arith.constant 0 : i32
    %c0_i32_0 = arith.constant 0 : i32
    %c0_i32_1 = arith.constant 0 : i32
    return %arg1, %c0_i32, %c0_i32_0 : i32, i32, i32
  }
  func.func @transform_4(%arg0: i32, %arg1: i32) -> (i32, i32, i32) {
    %c0_i32 = arith.constant 0 : i32
    %c0_i32_0 = arith.constant 0 : i32
    %c0_i32_1 = arith.constant 0 : i32
    return %arg1, %c0_i32, %c0_i32_0 : i32, i32, i32
  }
  func.func @transform_5(%arg0: i32, %arg1: i32) -> (i32, i32, i32) {
    %c0_i32 = arith.constant 0 : i32
    %c0_i32_0 = arith.constant 0 : i32
    %c0_i32_1 = arith.constant 0 : i32
    return %arg1, %c0_i32, %c0_i32_0 : i32, i32, i32
  }
  func.func @transform_6(%arg0: i32, %arg1: i32) -> (i32, i32, i32) {
    %c0_i32 = arith.constant 0 : i32
    %c0_i32_0 = arith.constant 0 : i32
    %c0_i32_1 = arith.constant 0 : i32
    return %arg1, %c0_i32, %c0_i32_0 : i32, i32, i32
  }
  func.func @transform_7(%arg0: i32, %arg1: i32) -> (i32, i32) {
    %c0_i32 = arith.constant 0 : i32
    %c0_i32_0 = arith.constant 0 : i32
    return %arg0, %c0_i32 : i32, i32
  }
  func.func @transform_8(%arg0: i32, %arg1: i32) -> (i32, i32, i32) {
    %c0_i32 = arith.constant 0 : i32
    %c0_i32_0 = arith.constant 0 : i32
    return %arg1, %arg0, %c0_i32 : i32, i32, i32
  }
  func.func @transform_9(%arg0: i32, %arg1: i32) -> (i32, i32, i32) {
    %c0_i32 = arith.constant 0 : i32
    %c0_i32_0 = arith.constant 0 : i32
    return %arg1, %arg0, %c0_i32 : i32, i32, i32
  }
  func.func @transform_10(%arg0: i32, %arg1: i32) -> (i32, i32, i32) {
    %c0_i32 = arith.constant 0 : i32
    %c0_i32_0 = arith.constant 0 : i32
    %c0_i32_1 = arith.constant 0 : i32
    return %arg0, %c0_i32, %c0_i32_0 : i32, i32, i32
  }
}

</mosaic_0001>

<bundles_post_ra>
// kernel: tpu_custom_call.1
= control target key start
LH: loop header
LB: loop body
LE: loop exit
PB: predicated region body
PF: predicated region fallthrough
CT: control target
= control target key end

     0   :  { %s2013_s0 = inlined_call_operand.vmem [shape: f32[32,32], index: 0, kind: input, shape index: {}]   ;;  %s2014_s1 = inlined_call_operand.vmem [shape: f32[6,32,8], index: 1, kind: input, shape index: {}]   ;;  %s2015_s2 = inlined_call_operand.vmem [shape: f32[6,1,8], index: 2, kind: input, shape index: {}]   ;;  %s2016_s3 = inlined_call_operand.vmem [shape: f32[6,8,128], index: 3, kind: input, shape index: {}]   ;;  %s2017_s4 = inlined_call_operand.vmem [shape: f32[6,128,8], index: 4, kind: input, shape index: {}]   ;;  %s2018_s5 = inlined_call_operand.vmem [shape: f32[6,128,32], index: 5, kind: input, shape index: {}]   ;;  %s2019_s6 = inlined_call_operand.vmem [shape: f32[6,1,32], index: 6, kind: input, shape index: {}]   ;;  %s2020_s7 = inlined_call_operand.hbm [shape: f32[32,32], index: 7, kind: output, shape index: {0}]   ;;  %s2021_s8 = inlined_call_operand.vmem [shape: s32[6,32,1], index: 8, kind: output, shape index: {1}]   ;;  %s2022_s9 = inlined_call_operand.vmem [shape: f32[6,32,8], index: 9, kind: output, shape index: {2}]   ;;  %s2023_s10 = inlined_call_operand.hbm [shape: f32[1,1,1], index: 10, kind: output, shape index: {3}]  }
   0x1   :  { %2025 = sst [smem:[#allocation11_spill]] %s2014_s1 }
   0x2   :  { %16 = vsyncpa [#allocation4], 0 }
   0x3   :  { %17 = vsyncpa [#allocation6], 0  ;;  %s1761_s13 = smov 0   ;;  %s1763_s14 = smov 0  }
   0x4   :  { %s1765_s15 = smov 0  }
   0x5 LB: > { %2026 = sst [smem:[#allocation9_spill]] %s1694_s14  ;;  %s32_s17 = sadd.s32 1, %s1694_s14  ;;  %s1698_s15 = sphi %s1765_s15, %s23_s15   ;;  %s1694_s14 = sphi %s1763_s14, %s2033_s14   ;;  %s1690_s13 = sphi %s1761_s13, %s2032_s13  }
   0x6   : > { %p33_p0 = scmp.ge.s32.totalorder %s32_s17, 6  ;;  %p1303_p1 = scmp.ge.s32.totalorder %s1698_s15, 1 }
   0x7   : > { %p393_p2 = scmp.lt.s32.totalorder %s1698_s15, 7 }
   0x8   : > { %s2035_s17 = smov (%p33_p0, %s32_s17), 0 }
   0x9   : > { %2027 = sst [smem:[#allocation10_spill]] %s2035_s17  ;;  %p394_p3 = pnand %p1303_p1, %p393_p2 }
   0xa   : > { %p475_p4 = scmp.lt.s32.totalorder (!%p394_p3), %s1690_s13, 5  ;;  %s2028_s1 = sld [smem:[#allocation11_spill]] (!%p394_p3) }
   0xb   : > { %397 = sbr.rel (%p394_p3) target bundleno = 1063 (0x427), region = 48  ;;  %p1315_p5 = scmp.ne.s32.totalorder (!%p394_p3), %s1690_s13, 0 }
  0x12   : > { %s1780_s18 = scalar_select %p475_p4, %s1690_s13, 5 }
  0x13   : > { %524 = sbr.rel (%p1315_p5) target bundleno = 26 (0x1a), region = 52  ;;  %v525_v0 = vld [vmem:[%s2013_s0] sm:$0xff] (!%p1315_p5)  ;;  %vm529_vm0 = vcmask (!%p1315_p5), 261120   ;;  %v526_v1 = vld [vmem:[%s2013_s0 + $0x8] sm:$0xff] (!%p1315_p5)  ;;  %v527_v2 = vld [vmem:[%s2013_s0 + $0x10] sm:$0xff] (!%p1315_p5)  ;;  %vm538_vm1 = vcmask (!%p1315_p5), 0  }
  0x14   : > { %s1344_s19 = sshll.u32 %s1780_s18, 5  ;;  %s1306_s26 = sshll.u32 %s1780_s18, 3  ;;  %530 = vst.msk [vmem:[#allocation2] sm:$0xff] (!%p1315_p5), %vm529_vm0, %v525_v0  ;;  %531 = vst.msk [vmem:[#allocation2 + $0x8] sm:$0xff] (!%p1315_p5), %vm529_vm0, %v526_v1  ;;  %v528_v3 = vld [vmem:[%s2013_s0 + $0x18] sm:$0xff] (!%p1315_p5)  ;;  %v1700_v4 = vmov (!%p1315_p5), 0.0  }
  0x15   : > { %s1790_s25 = scalar_lea.vmem %s2028_s1, %s1344_s19  ;;  %s1796_s29 = scalar_lea.vmem %s2016_s3, %s1306_s26  ;;  %532 = vst.msk [vmem:[#allocation2 + $0x10] sm:$0xff] (!%p1315_p5), %vm529_vm0, %v527_v2  ;;  %534 = vst.msk [vmem:[#allocation3] sm:$0xff] (!%p1315_p5), %vm529_vm0, %v1700_v4 }
  0x16   : > { %s1345_s30 = sshll.u32 %s1780_s18, 7  ;;  %s499_s22 = scalar_lea.vmem %s2019_s6, %s1780_s18  ;;  %535 = vst.msk [vmem:[#allocation3 + $0x8] sm:$0xff] (!%p1315_p5), %vm529_vm0, %v1700_v4  ;;  %536 = vst.msk [vmem:[#allocation3 + $0x10] sm:$0xff] (!%p1315_p5), %vm529_vm0, %v1700_v4 }
  0x17   : > { %s1802_s16 = scalar_lea.vmem %s2017_s4, %s1345_s30  ;;  %s1807_s21 = scalar_lea.vmem %s2018_s5, %s1345_s30  ;;  %537 = vst.msk [vmem:[#allocation3 + $0x18] sm:$0xff] (!%p1315_p5), %vm529_vm0, %v1700_v4  ;;  %533 = vst.msk [vmem:[#allocation2 + $0x18] sm:$0xff] (!%p1315_p5), %vm529_vm0, %v528_v3 }
  0x18   : > { %s1816_s26 = scalar_lea.vmem %s2021_s8, %s1344_s19  ;;  %s1821_s11 = scalar_lea.vmem %s2022_s9, %s1344_s19  ;;  %539 = vst.msk [vmem:[#allocation5] sm:$0x1] (!%p1315_p5), %vm538_vm1, %v1700_v4 }
  0x1a PF: > { %v544_v5 = vld [vmem:[%s1790_s25] sm:$0xff]  ;;  %v545_v6 = vld [vmem:[%s1790_s25 + $0x8] sm:$0xff]  ;;  %v546_v7 = vld [vmem:[%s1790_s25 + $0x10] sm:$0xff]  ;;  %vm555_vm2 = vcmask 261120   ;;  %s2029_s24 = scalar_lea.vmem %s2015_s2, %s1780_s18  ;;  %vm653_vm3 = vcmask 64512   ;;  %vm764_vm4 = vcmask 7168  }
  0x1b   : > { %v1500_v8 = vpack.c.bf16 %v545_v6, %v544_v5  ;;  %v547_v9 = vld [vmem:[%s1790_s25 + $0x18] sm:$0xff]  ;;  %v1839_v10 = vld [vmem:[#allocation2] sm:$0xff]  ;;  %v1843_v12 = vld [vmem:[#allocation2 + $0x8] sm:$0xff]  ;;  %s2030_s18 = sadd.s32 4294967295, %s1698_s15  }
  0x1c   : > { %v1504_v11 = vpack.c.bf16 %v547_v9, %v546_v7  ;;  %1410 = vmatprep.mubr.msk.f32.mxu0 %vm555_vm2, %v1839_v10  ;;  %v1845_v13 = vld [vmem:[#allocation2 + $0x10] sm:$0xff]  ;;  %v658_v15 = vld [vmem:[%s1796_s29] sm:$0xff]  ;;  %v784_v26 = vld [vmem:[%s1802_s16 + $0x8] sm:$0xff]  ;;  %p1956_p6 = scmp.eq.s32.totalorder %s2030_s18, 5 }
  0x1d   : > { %1501 = vmatprep.subr.bf16.mxu0 %v1500_v8  ;;  %1416 = vmatprep.subr.mxu1 %v658_v15  ;;  %v1316_v16 = vld [vmem:[%s2029_s24] ss:$0 sm:$0xff]  ;;  %v914_v29 = vld [vmem:[%s1807_s21 + $0x8] sm:$0xff]  ;;  %v785_v30 = vld [vmem:[%s1802_s16 + $0x10] sm:$0xff] }
  0x1e   : > { %1503 = vmatpush3.bf16.msra.mxu0 %v1500_v8  ;;  %v1851_v14 = vld [vmem:[#allocation2 + $0x18] sm:$0xff]  ;;  %1417 = vmatpush3.msra.mxu1 %v658_v15  ;;  %v783_v25 = vld [vmem:[%s1802_s16] sm:$0xff]  ;;  %v915_v34 = vld [vmem:[%s1807_s21 + $0x10] sm:$0xff] }
  0x1f   : > { %1505 = vmatprep.subr.bf16.mxu0 %v1504_v11  ;;  %v913_v27 = vld [vmem:[%s1807_s21] sm:$0xff]  ;;  %v1508_v28 = vpack.c.bf16 %v784_v26, %v783_v25  ;;  %v786_v31 = vld [vmem:[%s1802_s16 + $0x18] sm:$0xff]  ;;  %v788_v38 = vld [vmem:[%s1802_s16 + $0x28] sm:$0xff] }
  0x20   : > { %v1540_v32 = vpack.c.bf16 %v914_v29, %v913_v27  ;;  %v1512_v33 = vpack.c.bf16 %v786_v31, %v785_v30  ;;  %v916_v35 = vld [vmem:[%s1807_s21 + $0x18] sm:$0xff]  ;;  %v787_v36 = vld [vmem:[%s1802_s16 + $0x20] sm:$0xff]  ;;  %v918_v40 = vld [vmem:[%s1807_s21 + $0x28] sm:$0xff] }
  0x21   : > { %1509 = vmatprep.subr.bf16.mxu1 %v1508_v28  ;;  %v1544_v37 = vpack.c.bf16 %v916_v35, %v915_v34  ;;  %v917_v39 = vld [vmem:[%s1807_s21 + $0x20] sm:$0xff]  ;;  %v1516_v41 = vpack.c.bf16 %v788_v38, %v787_v36  ;;  %v789_v43 = vld [vmem:[%s1802_s16 + $0x30] sm:$0xff]  ;;  %v790_v44 = vld [vmem:[%s1802_s16 + $0x38] sm:$0xff] }
  0x22   : > { %1507 = vmatpush3.bf16.msra.mxu0 %v1504_v11  ;;  %v1548_v42 = vpack.c.bf16 %v918_v40, %v917_v39  ;;  %v919_v45 = vld [vmem:[%s1807_s21 + $0x30] sm:$0xff]  ;;  %v920_v46 = vld [vmem:[%s1807_s21 + $0x38] sm:$0xff]  ;;  %v1520_v47 = vpack.c.bf16 %v790_v44, %v789_v43  ;;  %v791_v49 = vld [vmem:[%s1802_s16 + $0x40] sm:$0xff] }
  0x23   : > { %1541 = vmatprep.subr.bf16.mxu0 %v1540_v32  ;;  %v1552_v48 = vpack.c.bf16 %v920_v46, %v919_v45  ;;  %v792_v50 = vld [vmem:[%s1802_s16 + $0x48] sm:$0xff]  ;;  %v921_v51 = vld [vmem:[%s1807_s21 + $0x40] sm:$0xff]  ;;  %v793_v55 = vld [vmem:[%s1802_s16 + $0x50] sm:$0xff] }
  0x24   : > { %v922_v52 = vld [vmem:[%s1807_s21 + $0x48] sm:$0xff]  ;;  %v1524_v53 = vpack.c.bf16 %v792_v50, %v791_v49  ;;  %v794_v56 = vld [vmem:[%s1802_s16 + $0x58] sm:$0xff]  ;;  %v923_v57 = vld [vmem:[%s1807_s21 + $0x50] sm:$0xff] }
  0x25   : > { %1411 = vmatmul.mubr.msk.f32.vlgmr.msra.gmra.mrb[0].mxu0 %vm555_vm2, %v1843_v12  ;;  %v1556_v54 = vpack.c.bf16 %v922_v52, %v921_v51  ;;  %v924_v58 = vld [vmem:[%s1807_s21 + $0x58] sm:$0xff]  ;;  %v1528_v59 = vpack.c.bf16 %v794_v56, %v793_v55  ;;  %v795_v61 = vld [vmem:[%s1802_s16 + $0x60] sm:$0xff]  ;;  %v796_v62 = vld [vmem:[%s1802_s16 + $0x68] sm:$0xff] }
  0x26   : > { %1413 = vmatprep.mubr.msk.f32.mxu0 %vm555_vm2, %v1845_v13  ;;  %1543 = vmatpush3.bf16.msra.mxu0 %v1540_v32  ;;  %v1560_v60 = vpack.c.bf16 %v924_v58, %v923_v57  ;;  %v925_v63 = vld [vmem:[%s1807_s21 + $0x60] sm:$0xff]  ;;  %v926_v0 = vld [vmem:[%s1807_s21 + $0x68] sm:$0xff]  ;;  %v1532_v1 = vpack.c.bf16 %v796_v62, %v795_v61  ;;  %v797_v7 = vld [vmem:[%s1802_s16 + $0x70] sm:$0xff] }
  0x27   : > { %1545 = vmatprep.subr.bf16.mxu0 %v1544_v37  ;;  %v1564_v2 = vpack.c.bf16 %v926_v0, %v925_v63  ;;  %v798_v8 = vld [vmem:[%s1802_s16 + $0x78] sm:$0xff]  ;;  %v927_v9 = vld [vmem:[%s1807_s21 + $0x70] sm:$0xff]  ;;  %v1022_v31 = vld [vmem:[#allocation3 + $0x8] sm:$0xff] }
  0x28   : > { %v1536_v11 = vpack.c.bf16 %v798_v8, %v797_v7  ;;  %v928_v15 = vld [vmem:[%s1807_s21 + $0x78] sm:$0xff]  ;;  %v1021_v36 = vld [vmem:[#allocation3] sm:$0xff]  ;;  %v1023_v51 = vld [vmem:[#allocation3 + $0x10] sm:$0xff]  ;;  %s1702_s21 = smov [#allocation3]  }
  0x29   : > { %1414 = vmatmul.mubr.msk.f32.gmra.mrb[2].mxu0 %vm555_vm2, %v1851_v14 }
  0x2a   : > { %1547 = vmatpush3.bf16.msra.mxu0 %v1544_v37 }
  0x2b   : > { %1549 = vmatprep.subr.bf16.mxu0 %v1548_v42 }
  0x2e   : > { %1551 = vmatpush3.bf16.msra.mxu0 %v1548_v42 }
  0x2f   : > { %1553 = vmatprep.subr.bf16.mxu0 %v1552_v48 }
  0x32   : > { %1555 = vmatpush3.bf16.msra.mxu0 %v1552_v48 }
  0x33   : > { %1557 = vmatprep.subr.bf16.mxu0 %v1556_v54 }
  0x36   : > { %1559 = vmatpush3.bf16.msra.mxu0 %v1556_v54 }
  0x37   : > { %1561 = vmatprep.subr.bf16.mxu0 %v1560_v60 }
  0x3a   : > { %1563 = vmatpush3.bf16.msra.mxu0 %v1560_v60 }
  0x3b   : > { %1565 = vmatprep.subr.bf16.mxu0 %v1564_v2 }
  0x3e   : > { %1567 = vmatpush3.bf16.msra.mxu0 %v1564_v2 }
  0xf8   : > { %v1412_v17 = vpop.f32.mrb[0].mxu0 }
  0xf9   : > { %v1861_v18 = vadd.f32 %v1412_v17, %v1316_v16  ;;  %v634_v19 = vpop.f32.mrb[1].mxu0  ;;  %v769_v17 = vlaneseq }
  0xfa   : > { %v1863_v20 = vadd.f32 %v1316_v16, %v634_v19 }
  0xfb   : > { %655 = vst.msk [vmem:[%s1821_s11 + $0x8] sm:$0xff] %vm653_vm3, %v1861_v18  ;;  %v770_v19 = vand.u32 127, %v769_v17 }
  0xfc   : > { %654 = vst.msk [vmem:[%s1821_s11] sm:$0xff] %vm653_vm3, %v1863_v20  ;;  %v1415_v21 = vpop.f32.mrb[2].mxu0  ;;  %1418 = vmatprep.mubr.msk.f32.mxu1 %vm653_vm3, %v1863_v20 }
  0xfd   : > { %v1873_v22 = vadd.f32 %v1415_v21, %v1316_v16  ;;  %v644_v23 = vpop.f32.mrb[3].mxu0  ;;  %1419 = vmatmul.mubr.msk.f32.vlgmr.msra.gmra.mrb[0].mxu1 %vm653_vm3, %v1861_v18 }
  0xfe   : > { %v1877_v24 = vadd.f32 %v1316_v16, %v644_v23  ;;  %1511 = vmatpush3.bf16.msra.mxu1 %v1508_v28  ;;  %v1568_v16 = vpack.c.bf16 %v928_v15, %v927_v9  ;;  %v1701_v23 = vmov 1.0   ;;  %v1333_v28 = vld [vmem:[%s499_s22] ss:$0 sm:$0xff] }
  0xff   : > { %657 = vst.msk [vmem:[%s1821_s11 + $0x18] sm:$0xff] %vm653_vm3, %v1873_v22  ;;  %1513 = vmatprep.subr.bf16.mxu1 %v1512_v33 }
 0x100   : > { %656 = vst.msk [vmem:[%s1821_s11 + $0x10] sm:$0xff] %vm653_vm3, %v1877_v24  ;;  %1421 = vmatprep.mubr.msk.f32.mxu1 %vm653_vm3, %v1877_v24  ;;  %1569 = vmatprep.subr.bf16.mxu0 %v1568_v16 }
 0x101   : > { %1422 = vmatmul.mubr.msk.f32.gmra.mrb[2].mxu1 %vm653_vm3, %v1873_v22  ;;  %1571 = vmatpush3.bf16.msra.mxu0 %v1568_v16 }
 0x102   : > { %1515 = vmatpush3.bf16.msra.mxu1 %v1512_v33 }
 0x103   : > { %1517 = vmatprep.subr.bf16.mxu1 %v1516_v41 }
 0x106   : > { %1519 = vmatpush3.bf16.msra.mxu1 %v1516_v41 }
 0x107   : > { %1521 = vmatprep.subr.bf16.mxu1 %v1520_v47 }
 0x10a   : > { %1523 = vmatpush3.bf16.msra.mxu1 %v1520_v47  ;;  %v1024_v47 = vld [vmem:[#allocation3 + $0x18] sm:$0xff] }
 0x10b   : > { %1525 = vmatprep.subr.bf16.mxu1 %v1524_v53 }
 0x10e   : > { %1527 = vmatpush3.bf16.msra.mxu1 %v1524_v53 }
 0x10f   : > { %1529 = vmatprep.subr.bf16.mxu1 %v1528_v59 }
 0x112   : > { %1531 = vmatpush3.bf16.msra.mxu1 %v1528_v59 }
 0x113   : > { %1533 = vmatprep.subr.bf16.mxu1 %v1532_v1 }
 0x116   : > { %1535 = vmatpush3.bf16.msra.mxu1 %v1532_v1 }
 0x117   : > { %1537 = vmatprep.subr.bf16.mxu1 %v1536_v11 }
 0x11a   : > { %1539 = vmatpush3.bf16.msra.mxu1 %v1536_v11 }
 0x1d0   : > { %v1420_v3 = vpop.f32.mrb[0].mxu1 }
 0x1d1   : > { %v737_v4 = vpop.f32.mrb[1].mxu1 }
 0x1d2   : > { %756 = vmax.index.xlane.f32.xlu0 %v737_v4 }
 0x1d4   : > { %v1423_v5 = vpop.f32.mrb[2].mxu1 }
 0x1d5   : > { %v747_v6 = vpop.f32.mrb[3].mxu1 }
 0x1d6   : > { %758 = vmax.index.xlane.f32.xlu0 %v1420_v3  ;;  %760 = vmax.index.xlane.f32.xlu1 %v747_v6 }
 0x1da   : > { %762 = vmax.index.xlane.f32.xlu1 %v1423_v5 }
 0x25f   : > { %v757_v21 = vpop.xlane.xlu0 %756 }
 0x260   : > { %765 = vst.msk [vmem:[%s1816_s26] sm:$0xff] %vm764_vm4, %v757_v21  ;;  %vm771_vm5 = vcmp.eq.s32.totalorder %v757_v21, %v770_v19 }
 0x261   : > { %1456 = vmatprep.mubr.msk.f32.mxu1 %vm771_vm5, %v1701_v23  ;;  %1494 = vmatprep.mubr.msk.f32.mxu0 %vm771_vm5, %v1701_v23 }
 0x263   : > { %v759_v25 = vpop.xlane.xlu0 %758  ;;  %v761_v26 = vpop.xlane.xlu1 %760 }
 0x264   : > { %766 = vst.msk [vmem:[%s1816_s26 + $0x8] sm:$0xff] %vm764_vm4, %v759_v25  ;;  %vm772_vm6 = vcmp.eq.s32.totalorder %v759_v25, %v770_v19  ;;  %767 = vst.msk [vmem:[%s1816_s26 + $0x10] sm:$0xff] %vm764_vm4, %v761_v26  ;;  %vm773_vm7 = vcmp.eq.s32.totalorder %v761_v26, %v770_v19 }
 0x265   : > { %1457 = vmatmul.mubr.msk.f32.vlgmr.msra.gmra.mrb[4].mxu1 %vm772_vm6, %v1701_v23  ;;  %1495 = vmatmul.mubr.msk.f32.vlgmr.msra.gmra.mrb[4].mxu0 %vm772_vm6, %v1701_v23 }
 0x266   : > { %1459 = vmatprep.mubr.msk.f32.mxu1 %vm773_vm7, %v1701_v23  ;;  %1497 = vmatprep.mubr.msk.f32.mxu0 %vm773_vm7, %v1701_v23 }
 0x267   : > { %v763_v27 = vpop.xlane.xlu1 %762 }
 0x268   : > { %768 = vst.msk [vmem:[%s1816_s26 + $0x18] sm:$0xff] %vm764_vm4, %v763_v27  ;;  %vm774_vm8 = vcmp.eq.s32.totalorder %v763_v27, %v770_v19  ;;  %s1068_s26 = sshll.u32 %s1702_s21, 4  ;;  %s1069_s26 = int_to_ptr.vmem [resolvable:$true] %s1068_s26 }
 0x269   : > { %1460 = vmatmul.mubr.msk.f32.gmra.mrb[6].mxu1 %vm774_vm8, %v1701_v23  ;;  %1498 = vmatmul.mubr.msk.f32.gmra.mrb[6].mxu0 %vm774_vm8, %v1701_v23  ;;  %s1616_s27 = scalar_lea.vmem %s1069_s26, 512  ;;  %p1623_p10 = scmp.lt.s32.totalorder %s1069_s26, %s1069_s26 }
 0x26a   : > { %p1617_p7 = scmp.ne.s32.totalorder %s1069_s26, %s1616_s27  ;;  %p1624_p11 = scmp.lt.s32.totalorder %s1616_s27, %s1616_s27 }
 0x26c   : > { %p1618_p8 = pnand %p1617_p7, %p1956_p6  ;;  %p1625_p12 = por %p1624_p11, %p1623_p10 }
 0x26e   : > { %p1619_p9 = pneg %p1618_p8 }
 0x270   : > { %p1626_p13 = pnand %p1625_p12, %p1619_p9 }
 0x338   : > { %v1458_v29 = vpop.f32.mrb[4].mxu1  ;;  %v1496_v30 = vpop.f32.mrb[4].mxu0 }
 0x339   : > { %v885_v32 = vsub.f32 %v1861_v18, %v1458_v29  ;;  %v1008_v33 = vadd.f32 %v1496_v30, %v1333_v28  ;;  %v865_v34 = vpop.f32.mrb[5].mxu1  ;;  %v1002_v35 = vpop.f32.mrb[5].mxu0 }
 0x33a   : > { %v884_v37 = vsub.f32 %v1863_v20, %v865_v34  ;;  %v1003_v38 = vadd.f32 %v1333_v28, %v1002_v35 }
 0x33b   : > { %v889_v39 = vmul.f32 %v885_v32, %v885_v32  ;;  %v1026_v40 = vadd.f32 %v1022_v31, %v1008_v33  ;;  %v1034_v41 = vsub.f32 %v1843_v12, %v1008_v33 }
 0x33c   : > { %v888_v42 = vmul.f32 %v884_v37, %v884_v37  ;;  %v1025_v43 = vadd.f32 %v1021_v36, %v1003_v38  ;;  %v1033_v44 = vsub.f32 %v1839_v10, %v1003_v38  ;;  %v1461_v45 = vpop.f32.mrb[6].mxu1  ;;  %v1499_v46 = vpop.f32.mrb[6].mxu0 }
 0x33d   : > { %v894_v18 = vsel %vm653_vm3, %v889_v39, 0.0  ;;  %1030 = vst.msk [vmem:[#allocation3 + $0x8] sm:$0xff] %vm555_vm2, %v1026_v40  ;;  %1038 = vst.msk [vmem:[#allocation2 + $0x8] sm:$0xff] %vm555_vm2, %v1034_v41  ;;  %v887_v20 = vsub.f32 %v1873_v22, %v1461_v45  ;;  %v1018_v48 = vadd.f32 %v1499_v46, %v1333_v28  ;;  %v875_v49 = vpop.f32.mrb[7].mxu1  ;;  %v1012_v50 = vpop.f32.mrb[7].mxu0 }
 0x33e   : > { %v893_v12 = vsel %vm653_vm3, %v888_v42, 0.0  ;;  %1029 = vst.msk [vmem:[#allocation3] sm:$0xff] %vm555_vm2, %v1025_v43  ;;  %1037 = vst.msk [vmem:[#allocation2] sm:$0xff] %vm555_vm2, %v1033_v44  ;;  %v886_v10 = vsub.f32 %v1877_v24, %v875_v49  ;;  %v1013_v52 = vadd.f32 %v1333_v28, %v1012_v50 }
 0x33f   : > { %v895_v53 = vadd.f32 %v894_v18, %v893_v12  ;;  %v1028_v54 = vadd.f32 %v1024_v47, %v1018_v48  ;;  %v1036_v55 = vsub.f32 %v1851_v14, %v1018_v48  ;;  %v891_v56 = vmul.f32 %v887_v20, %v887_v20 }
 0x340   : > { %v890_v22 = vmul.f32 %v886_v10, %v886_v10  ;;  %v1027_v57 = vadd.f32 %v1023_v51, %v1013_v52  ;;  %v1035_v58 = vsub.f32 %v1845_v13, %v1013_v52 }
 0x341   : > { %1032 = vst.msk [vmem:[#allocation3 + $0x18] sm:$0xff] %vm555_vm2, %v1028_v54  ;;  %1040 = vst.msk [vmem:[#allocation2 + $0x18] sm:$0xff] %vm555_vm2, %v1036_v55  ;;  %v898_v60 = vsel %vm653_vm3, %v891_v56, 0.0 }
 0x342   : > { %v896_v59 = vsel %vm653_vm3, %v890_v22, 0.0  ;;  %1031 = vst.msk [vmem:[#allocation3 + $0x10] sm:$0xff] %vm555_vm2, %v1027_v57  ;;  %1039 = vst.msk [vmem:[#allocation2 + $0x10] sm:$0xff] %vm555_vm2, %v1035_v58 }
 0x343   : > { %v897_v24 = vadd.f32 %v896_v59, %v895_v53 }
 0x345   : > { %v899_v61 = vadd.f32 %v898_v60, %v897_v24 }
 0x347   : > { %900 = vadd.xlane.f32.xlu0 %v899_v61 }
 0x348   : > { %1629 = shalt.err (!%p1626_p13)
}
 0x349   : > { %s1630_s12 = scalar_lea.hbm %s2020_s7, 512 }
 0x34a   : > { %p1631_p0 = scmp.ne.s32.totalorder %s2020_s7, %s1630_s12  ;;  %p1636_p3 = scmp.lt.u32.totalorder %s1630_s12, %s2020_s7 }
 0x34c   : > { %p1632_p1 = pnand %p1631_p0, %p1956_p6 }
 0x34e   : > { %p1633_p2 = pneg %p1632_p1 }
 0x350   : > { %p1638_p4 = pnand %p1636_p3, %p1633_p2 }
 0x352   : > { %1641 = shalt.err (!%p1638_p4)
}
 0x353   : > { %s1703_s1 = smov 128   ;;  %s1704_s14 = smov 8   ;;  %v892_v3 = vld [vmem:[#allocation5] sm:$0x1]  ;;  %vm911_vm9 = vcmask 0  }
 0x354   : > { %1575 = dma.vmem_to_hbm [thread:$0]  (%p1956_p6), %s1069_s26, 512, %s2020_s7, [#allocation4], %s1703_s1, %s1703_s1, %s1704_s14  }
 0x355   : > { %s1705_s25 = smov [#allocation5]  }
 0x356   : > { %s1092_s24 = sshll.u32 %s1705_s25, 4  ;;  %s1093_s24 = int_to_ptr.vmem [resolvable:$true] %s1092_s24 }
 0x357   : > { %s1642_s29 = scalar_lea.vmem %s1093_s24, 16  ;;  %s1648_s18 = scalar_lea.vmem %s1093_s24, 32 }
 0x358   : > { %p1643_p5 = scmp.ne.s32.totalorder %s1093_s24, %s1642_s29  ;;  %p1649_p9 = scmp.lt.s32.totalorder %s1093_s24, %s1093_s24 }
 0x359   : > { %p1650_p10 = scmp.lt.s32.totalorder %s1648_s18, %s1642_s29 }
 0x35a   : > { %p1644_p7 = pnand %p1643_p5, %p1956_p6 }
 0x35b   : > { %p1651_p11 = por %p1650_p10, %p1649_p9 }
 0x35c   : > { %p1645_p8 = pneg %p1644_p7 }
 0x35e   : > { %p1652_p12 = pnand %p1651_p11, %p1645_p8 }
 0x3d4   : > { %v901_v13 = vpop.xlane.xlu0 %900 }
 0x3d5   : > { %v902_v14 = vrot.slane %v901_v13, 4 }
 0x3d7   : > { %v903_v62 = vadd.f32 %v902_v14, %v901_v13 }
 0x3d9   : > { %v904_v63 = vrot.slane %v903_v62, 2 }
 0x3db   : > { %v905_v0 = vadd.f32 %v904_v63, %v903_v62 }
 0x3dd   : > { %v906_v1 = vrot.slane %v905_v0, 1 }
 0x3df   : > { %v907_v2 = vadd.f32 %v906_v1, %v905_v0 }
 0x3e1   : > { %1572 = vpush %v907_v2 }
 0x412   : > { %s1573_s16 = spop %1572 }
 0x413   : > { %v909_v4 = vstv %s1573_s16 }
 0x414   : > { %v910_v5 = vadd.f32 %v909_v4, %v892_v3 }
 0x416   : > { %912 = vst.msk [vmem:[#allocation5] sm:$0x1] %vm911_vm9, %v910_v5 }
 0x417   : > { %1655 = shalt.err (!%p1652_p12)
}
 0x418   : > { %s1656_s27 = scalar_lea.hbm %s2023_s10, 16 }
 0x419   : > { %p1657_p13 = scmp.ne.s32.totalorder %s2023_s10, %s1656_s27  ;;  %p1662_p2 = scmp.lt.u32.totalorder %s1656_s27, %s2023_s10 }
 0x41b   : > { %p1658_p0 = pnand %p1657_p13, %p1956_p6 }
 0x41d   : > { %p1659_p1 = pneg %p1658_p0 }
 0x41f   : > { %p1664_p3 = pnand %p1662_p2, %p1659_p1 }
 0x421   : > { %1667 = shalt.err (!%p1664_p3)
}
 0x422   : > { %1577 = dma.vmem_to_hbm [thread:$0]  (%p1956_p6), %s1093_s24, 16, %s2023_s10, [#allocation6]  }
 0x423   : > { %1681 = dma.done.wait (%p1956_p6), [#allocation4], 512  }
 0x424   : > { %1683 = vsyncadd (%p1956_p6), [#allocation4], 4294966784 }
 0x425   : > { %1685 = dma.done.wait (%p1956_p6), [#allocation6], 16  }
 0x426   : > { %1687 = vsyncadd (%p1956_p6), [#allocation6], 4294967280 }
 0x427 PF: > { %s23_s15 = sadd.s32 1, %s1698_s15   ;;  %s2032_s13 = sld [smem:[#allocation9_spill]] }
 0x428   : > { %p20_p4 = scmp.ge.s32.totalorder %s23_s15, 8   ;;  %s2033_s14 = sld [smem:[#allocation10_spill]] }
 0x42a   :  { %22 = sbr.rel (!%p20_p4) target bundleno = 5 (0x5), region = 131 }
 0x431   :  { %1133 = vsyncpa [#allocation4], 1 }
 0x432   :  { %1135 = vsyncpa [#allocation4 + $0x1], 1 }
 0x433   :  { %1136 = vsyncpa [#allocation6], 1 }

</bundles_post_ra>
